<compile_context>
chip_gen: v6e
topology: v6e:2x2x1
jax: 0.10.0
libtpu: 0.0.40
codegen_flags: <defaults>
</compile_context>

<pallas_src>
import math

import jax
import jax.numpy as jnp
from jax.experimental import pallas as pl
from jax.experimental.pallas import tpu as pltpu


def make_bezier(num_bends: int):
    """Builds the Bezier module forward passes (scalar-t and batched-t)."""
    lanes = 128 * pl.cdiv(num_bends, 128)          # lane-dense padded output width
    n_minus_1 = num_bends - 1
    nbits = max(1, n_minus_1.bit_length())         # bits needed for the exponents
    # rev_k bits are the complement of k bits iff n-1 is all-ones in nbits bits.
    fuse_chains = n_minus_1 > 0 and (n_minus_1 & (n_minus_1 + 1)) == 0
    binom_vals = [float(math.comb(n_minus_1, i)) for i in range(num_bends)]

    def bezier_kernel(t_ref, out_ref):
        t = t_ref[...]                              # (T_pad, 1) f32 column
        omt = jnp.float32(1.0) - t

        # Lane position k (raw for the binom build so padded lanes stay exactly 0;
        # clamped for the exponent bit masks).  All static integer work — a handful
        # of (1, lanes) VALU ops, no HBM input DMA for any of the three buffers.
        k_raw = jax.lax.broadcasted_iota(jnp.int32, (1, lanes), 1)
        k = jnp.minimum(k_raw, n_minus_1)

        # register_buffer('binom', ...) rebuilt from splat constants.
        binom = jnp.zeros((1, lanes), jnp.float32)
        for i in range(num_bends):
            binom = jnp.where(k_raw == i, jnp.float32(binom_vals[i]), binom)

        # Exact t^k * (1-t)^(n-1-k) via binary-expansion multiply chain, with the
        # accumulator seeded by binom (no separate final multiplies).  0^0 == 1.
        acc = binom                                  # (1, lanes) -> broadcasts up
        t_p, omt_p = t, omt                          # base^(2^b), squared per bit
        for b in range(nbits):
            if fuse_chains:
                bit_k = ((k >> b) & 1) == 1
                acc = acc * jnp.where(bit_k, t_p, omt_p)
            else:
                rev_k = n_minus_1 - k
                bit_k = ((k >> b) & 1) == 1
                bit_r = ((rev_k >> b) & 1) == 1
                acc = acc * jnp.where(bit_k, t_p, jnp.float32(1.0))
                acc = acc * jnp.where(bit_r, omt_p, jnp.float32(1.0))
            if b + 1 < nbits:
                t_p = t_p * t_p
                omt_p = omt_p * omt_p

        out_ref[...] = acc                           # (T_pad, lanes), unmasked vst

    def _run(t_col):
        t_pad = t_col.shape[0]
        return pl.pallas_call(
            bezier_kernel,
            out_shape=jax.ShapeDtypeStruct((t_pad, lanes), jnp.float32),
            in_specs=[pl.BlockSpec(memory_space=pltpu.MemorySpace.VMEM)],
            out_specs=pl.BlockSpec(memory_space=pltpu.MemorySpace.VMEM),
            cost_estimate=pl.CostEstimate(
                flops=t_pad * lanes * (3 * nbits + 2),
                transcendentals=0,
                bytes_accessed=4 * t_pad * (lanes + 1),
            ),
        )(t_col)

    @jax.jit
    def forward(t):
        """Scalar t -> (num_bends,) coefficients (the module's forward)."""
        t_col = jnp.broadcast_to(jnp.asarray(t, jnp.float32).reshape(1, 1), (8, 1))
        return _run(t_col)[0, :num_bends]

    @jax.jit
    def forward_batched(ts):
        """(T,) t values -> (T, num_bends); amortizes the launch/DMA fixed cost."""
        # TODO(synk): add a sublane grid for very large T (> ~60k rows) to stay in VMEM.
        ts = jnp.asarray(ts, jnp.float32).reshape(-1)
        t_count = ts.shape[0]
        t_pad = max(8, 8 * pl.cdiv(t_count, 8))
        t_col = jnp.zeros((t_pad, 1), jnp.float32).at[:t_count, 0].set(ts)
        return _run(t_col)[:t_count, :num_bends]

    return forward, forward_batched


if __name__ == "__main__":
    num_bends = 8  # small, consistent with the module's __init__(num_bends)

    bezier_forward, bezier_forward_batched = make_bezier(num_bends)

    key = jax.random.PRNGKey(0)
    t_rand = jax.random.uniform(key, (), dtype=jnp.float32)  # scalar t in [0, 1)

    def reference(t):
        # Plain-JAX reference with integer exponents (matches torch.pow, 0**0 == 1).
        t = jnp.asarray(t, jnp.float32)
        return jnp.stack(
            [
                jnp.float32(math.comb(num_bends - 1, k))
                * t ** k
                * (1.0 - t) ** (num_bends - 1 - k)
                for k in range(num_bends)
            ]
        )

    # Scalar path: random t plus the t in {0, 1} edge cases that break float pow.
    for tv in [t_rand, jnp.float32(0.0), jnp.float32(1.0), jnp.float32(0.25)]:
        out = bezier_forward(tv)
        jax.block_until_ready(out)
        ref = reference(tv)
        assert out.shape == (num_bends,)
        assert out.dtype == jnp.float32
        assert bool(jnp.all(jnp.isfinite(out)))
        assert jnp.allclose(out, ref, rtol=1e-6, atol=1e-7)

    # Batched path: 64 t values in a single launch.
    ts = jnp.linspace(0.0, 1.0, 64, dtype=jnp.float32)
    out_b = bezier_forward_batched(ts)
    jax.block_until_ready(out_b)
    ref_b = jnp.stack([reference(tv) for tv in ts])
    assert out_b.shape == (64, num_bends)
    assert out_b.dtype == jnp.float32
    assert bool(jnp.all(jnp.isfinite(out_b)))
    assert jnp.allclose(out_b, ref_b, rtol=1e-6, atol=1e-7)

    print("KERNEL_OK")
</pallas_src>

<mosaic_0001>
module attributes {stable_mosaic.version = 11 : i64} {
  func.func @bezier_kernel(%arg0: memref<8x1xf32, #tpu.memory_space<vmem>>, %arg1: memref<8x128xf32, #tpu.memory_space<vmem>>) attributes {dimension_semantics = [], scalar_prefetch = 0 : i64, scratch_operands = 0 : i64, tpu.core_type = #tpu.core_type<tc>} {
    %c0 = arith.constant 0 : index
    %c0_0 = arith.constant 0 : index
    %0 = vector.load %arg0[%c0, %c0_0] : memref<8x1xf32, #tpu.memory_space<vmem>>, vector<8x1xf32>
    %cst = arith.constant 1.000000e+00 : f32
    %1 = vector.broadcast %cst : f32 to vector<8x1xf32>
    %2 = arith.subf %1, %0 : vector<8x1xf32>
    %3 = tpu.iota {dimensions = array<i32: 1>} : vector<1x128xi32>
    %c7_i32 = arith.constant 7 : i32
    %4 = vector.broadcast %c7_i32 : i32 to vector<1x128xi32>
    %5 = arith.minsi %3, %4 : vector<1x128xi32>
    %cst_1 = arith.constant 0.000000e+00 : f32
    %6 = vector.broadcast %cst_1 : f32 to vector<1x128xf32>
    %c0_i32 = arith.constant 0 : i32
    %7 = vector.broadcast %c0_i32 : i32 to vector<1x128xi32>
    %8 = arith.cmpi eq, %3, %7 : vector<1x128xi32>
    %cst_2 = arith.constant 1.000000e+00 : f32
    %9 = vector.broadcast %cst_2 : f32 to vector<1x128xf32>
    %10 = arith.select %8, %9, %6 : vector<1x128xi1>, vector<1x128xf32>
    %c1_i32 = arith.constant 1 : i32
    %11 = vector.broadcast %c1_i32 : i32 to vector<1x128xi32>
    %12 = arith.cmpi eq, %3, %11 : vector<1x128xi32>
    %cst_3 = arith.constant 7.000000e+00 : f32
    %13 = vector.broadcast %cst_3 : f32 to vector<1x128xf32>
    %14 = arith.select %12, %13, %10 : vector<1x128xi1>, vector<1x128xf32>
    %c2_i32 = arith.constant 2 : i32
    %15 = vector.broadcast %c2_i32 : i32 to vector<1x128xi32>
    %16 = arith.cmpi eq, %3, %15 : vector<1x128xi32>
    %cst_4 = arith.constant 2.100000e+01 : f32
    %17 = vector.broadcast %cst_4 : f32 to vector<1x128xf32>
    %18 = arith.select %16, %17, %14 : vector<1x128xi1>, vector<1x128xf32>
    %c3_i32 = arith.constant 3 : i32
    %19 = vector.broadcast %c3_i32 : i32 to vector<1x128xi32>
    %20 = arith.cmpi eq, %3, %19 : vector<1x128xi32>
    %cst_5 = arith.constant 3.500000e+01 : f32
    %21 = vector.broadcast %cst_5 : f32 to vector<1x128xf32>
    %22 = arith.select %20, %21, %18 : vector<1x128xi1>, vector<1x128xf32>
    %c4_i32 = arith.constant 4 : i32
    %23 = vector.broadcast %c4_i32 : i32 to vector<1x128xi32>
    %24 = arith.cmpi eq, %3, %23 : vector<1x128xi32>
    %cst_6 = arith.constant 3.500000e+01 : f32
    %25 = vector.broadcast %cst_6 : f32 to vector<1x128xf32>
    %26 = arith.select %24, %25, %22 : vector<1x128xi1>, vector<1x128xf32>
    %c5_i32 = arith.constant 5 : i32
    %27 = vector.broadcast %c5_i32 : i32 to vector<1x128xi32>
    %28 = arith.cmpi eq, %3, %27 : vector<1x128xi32>
    %cst_7 = arith.constant 2.100000e+01 : f32
    %29 = vector.broadcast %cst_7 : f32 to vector<1x128xf32>
    %30 = arith.select %28, %29, %26 : vector<1x128xi1>, vector<1x128xf32>
    %c6_i32 = arith.constant 6 : i32
    %31 = vector.broadcast %c6_i32 : i32 to vector<1x128xi32>
    %32 = arith.cmpi eq, %3, %31 : vector<1x128xi32>
    %cst_8 = arith.constant 7.000000e+00 : f32
    %33 = vector.broadcast %cst_8 : f32 to vector<1x128xf32>
    %34 = arith.select %32, %33, %30 : vector<1x128xi1>, vector<1x128xf32>
    %c7_i32_9 = arith.constant 7 : i32
    %35 = vector.broadcast %c7_i32_9 : i32 to vector<1x128xi32>
    %36 = arith.cmpi eq, %3, %35 : vector<1x128xi32>
    %cst_10 = arith.constant 1.000000e+00 : f32
    %37 = vector.broadcast %cst_10 : f32 to vector<1x128xf32>
    %38 = arith.select %36, %37, %34 : vector<1x128xi1>, vector<1x128xf32>
    %c0_i32_11 = arith.constant 0 : i32
    %39 = vector.broadcast %c0_i32_11 : i32 to vector<1x128xi32>
    %40 = arith.shrsi %5, %39 : vector<1x128xi32>
    %c1_i32_12 = arith.constant 1 : i32
    %41 = vector.broadcast %c1_i32_12 : i32 to vector<1x128xi32>
    %42 = arith.andi %40, %41 : vector<1x128xi32>
    %c1_i32_13 = arith.constant 1 : i32
    %43 = vector.broadcast %c1_i32_13 : i32 to vector<1x128xi32>
    %44 = arith.cmpi eq, %42, %43 : vector<1x128xi32>
    %45 = vector.shape_cast %44 : vector<1x128xi1> to vector<1x128xi1>
    %46 = vector.broadcast %45 : vector<1x128xi1> to vector<8x128xi1>
    %47 = vector.shape_cast %0 : vector<8x1xf32> to vector<8x1xf32>
    %48 = vector.broadcast %47 : vector<8x1xf32> to vector<8x128xf32>
    %49 = vector.shape_cast %2 : vector<8x1xf32> to vector<8x1xf32>
    %50 = vector.broadcast %49 : vector<8x1xf32> to vector<8x128xf32>
    %51 = arith.select %46, %48, %50 : vector<8x128xi1>, vector<8x128xf32>
    %52 = vector.broadcast %38 : vector<1x128xf32> to vector<8x128xf32>
    %53 = arith.mulf %52, %51 : vector<8x128xf32>
    %54 = arith.mulf %0, %0 : vector<8x1xf32>
    %55 = arith.mulf %2, %2 : vector<8x1xf32>
    %c1_i32_14 = arith.constant 1 : i32
    %56 = vector.broadcast %c1_i32_14 : i32 to vector<1x128xi32>
    %57 = arith.shrsi %5, %56 : vector<1x128xi32>
    %c1_i32_15 = arith.constant 1 : i32
    %58 = vector.broadcast %c1_i32_15 : i32 to vector<1x128xi32>
    %59 = arith.andi %57, %58 : vector<1x128xi32>
    %c1_i32_16 = arith.constant 1 : i32
    %60 = vector.broadcast %c1_i32_16 : i32 to vector<1x128xi32>
    %61 = arith.cmpi eq, %59, %60 : vector<1x128xi32>
    %62 = vector.shape_cast %61 : vector<1x128xi1> to vector<1x128xi1>
    %63 = vector.broadcast %62 : vector<1x128xi1> to vector<8x128xi1>
    %64 = vector.shape_cast %54 : vector<8x1xf32> to vector<8x1xf32>
    %65 = vector.broadcast %64 : vector<8x1xf32> to vector<8x128xf32>
    %66 = vector.shape_cast %55 : vector<8x1xf32> to vector<8x1xf32>
    %67 = vector.broadcast %66 : vector<8x1xf32> to vector<8x128xf32>
    %68 = arith.select %63, %65, %67 : vector<8x128xi1>, vector<8x128xf32>
    %69 = arith.mulf %53, %68 : vector<8x128xf32>
    %70 = arith.mulf %54, %54 : vector<8x1xf32>
    %71 = arith.mulf %55, %55 : vector<8x1xf32>
    %c2_i32_17 = arith.constant 2 : i32
    %72 = vector.broadcast %c2_i32_17 : i32 to vector<1x128xi32>
    %73 = arith.shrsi %5, %72 : vector<1x128xi32>
    %c1_i32_18 = arith.constant 1 : i32
    %74 = vector.broadcast %c1_i32_18 : i32 to vector<1x128xi32>
    %75 = arith.andi %73, %74 : vector<1x128xi32>
    %c1_i32_19 = arith.constant 1 : i32
    %76 = vector.broadcast %c1_i32_19 : i32 to vector<1x128xi32>
    %77 = arith.cmpi eq, %75, %76 : vector<1x128xi32>
    %78 = vector.shape_cast %77 : vector<1x128xi1> to vector<1x128xi1>
    %79 = vector.broadcast %78 : vector<1x128xi1> to vector<8x128xi1>
    %80 = vector.shape_cast %70 : vector<8x1xf32> to vector<8x1xf32>
    %81 = vector.broadcast %80 : vector<8x1xf32> to vector<8x128xf32>
    %82 = vector.shape_cast %71 : vector<8x1xf32> to vector<8x1xf32>
    %83 = vector.broadcast %82 : vector<8x1xf32> to vector<8x128xf32>
    %84 = arith.select %79, %81, %83 : vector<8x128xi1>, vector<8x128xf32>
    %85 = arith.mulf %69, %84 : vector<8x128xf32>
    %c0_20 = arith.constant 0 : index
    %c0_21 = arith.constant 0 : index
    %86 = vector.load %arg1[%c0_20, %c0_21] : memref<8x128xf32, #tpu.memory_space<vmem>>, vector<8x128xf32>
    tpu.vector_store %arg1[%c0_20, %c0_21], %85 {strides = array<i32>} : memref<8x128xf32, #tpu.memory_space<vmem>>, vector<8x128xf32>,
    return
  }
}

</mosaic_0001>

<bundles_post_ra>
// kernel: forward.1
= control target key start
LH: loop header
LB: loop body
LE: loop exit
PB: predicated region body
PF: predicated region fallthrough
CT: control target
= control target key end

     0   :  { %v93_v0 = vmov 0   ;;  %v10_v7 = vlaneseq  ;;  %v94_v9 = vmov 0.0   ;;  %s111_s0 = inlined_call_operand.vmem [shape: f32[8,1], index: 0, kind: input, shape index: {}]   ;;  %s112_s1 = inlined_call_operand.vmem [shape: f32[8,128], index: 1, kind: output, shape index: {}]  }
   0x1   :  { %91 = vset.pattern.permute.xlu0 %v93_v0  ;;  %v8_v1 = vld [vmem:[%s111_s0] sm:$0xff]  ;;  %92 = vset.pattern.permute.xlu1 %v93_v0 }
   0x2   :  { %36 = vperm.xlu0 %91, %v8_v1   ;;  %v46_v2 = vmul.f32 %v8_v1, %v8_v1  ;;  %v9_v3 = vsub.f32 1.0, %v8_v1  ;;  %v11_v8 = vand.u32 127, %v10_v7 }
   0x4   :  { %55 = vperm.xlu1 %92, %v46_v2   ;;  %v47_v4 = vmul.f32 %v9_v3, %v9_v3  ;;  %v65_v5 = vmul.f32 %v46_v2, %v46_v2  ;;  %vm14_vm0 = vcmp.eq.s32.totalorder %v11_v8, 0  ;;  %vm16_vm1 = vcmp.eq.s32.totalorder %v11_v8, 1 }
   0x5   :  { %v15_v10 = vsel %vm14_vm0, 1.0, %v94_v9  ;;  %vm18_vm2 = vcmp.eq.s32.totalorder %v11_v8, 2  ;;  %vm20_vm3 = vcmp.eq.s32.totalorder %v11_v8, 3  ;;  %vm12_vm4 = vcmp.lt.s32.totalorder %v11_v8, 7 }
   0x6   :  { %41 = vperm.xlu0 %91, %v9_v3   ;;  %v66_v6 = vmul.f32 %v47_v4, %v47_v4  ;;  %v17_v11 = vsel %vm16_vm1, 7.0, %v15_v10  ;;  %vm22_vm5 = vcmp.eq.s32.totalorder %v11_v8, 4  ;;  %v13_v14 = vsel %vm12_vm4, %v11_v8, 7 }
   0x7   :  { %v19_v12 = vsel %vm18_vm2, 21.0, %v17_v11  ;;  %vm24_vm6 = vcmp.eq.s32.totalorder %v11_v8, 5  ;;  %v48_v16 = vshra.s32 %v13_v14, 1  ;;  %vm26_vm7 = vcmp.eq.s32.totalorder %v11_v8, 6 }
   0x8   :  { %60 = vperm.xlu1 %92, %v47_v4   ;;  %v21_v13 = vsel %vm20_vm3, 35.0, %v19_v12  ;;  %v30_v18 = vand.u32 1, %v13_v14  ;;  %vm28_vm8 = vcmp.eq.s32.totalorder %v11_v8, 7  ;;  %v67_v22 = vshra.s32 %v13_v14, 2 }
   0x9   :  { %v23_v15 = vsel %vm22_vm5, 35.0, %v21_v13  ;;  %v49_v21 = vand.u32 1, %v48_v16 }
   0xa   :  { %74 = vperm.xlu0 %91, %v65_v5   ;;  %v25_v17 = vsel %vm24_vm6, 21.0, %v23_v15  ;;  %vm31_vm9 = vcmp.eq.s32.totalorder %v30_v18, 1  ;;  %v68_v26 = vand.u32 1, %v67_v22 }
   0xb   :  { %v27_v20 = vsel %vm26_vm7, 7.0, %v25_v17  ;;  %vm50_vm10 = vcmp.eq.s32.totalorder %v49_v21, 1 }
   0xc   :  { %79 = vperm.xlu1 %92, %v66_v6   ;;  %v29_v24 = vsel %vm28_vm8, 1.0, %v27_v20  ;;  %vm69_vm11 = vcmp.eq.s32.totalorder %v68_v26, 1 }
  0x7d   :  { %v37_v19 = vpop.permute.xlu0 %36 }
  0x7f   :  { %v56_v23 = vpop.permute.xlu1 %55 }
  0x81   :  { %v42_v25 = vpop.permute.xlu0 %41 }
  0x82   :  { %v44_v27 = vsel %vm31_vm9, %v37_v19, %v42_v25 }
  0x83   :  { %v45_v28 = vmul.f32 %v44_v27, %v29_v24  ;;  %v61_v29 = vpop.permute.xlu1 %60 }
  0x84   :  { %v63_v30 = vsel %vm50_vm10, %v56_v23, %v61_v29 }
  0x85   :  { %v64_v31 = vmul.f32 %v63_v30, %v45_v28  ;;  %v75_v32 = vpop.permute.xlu0 %74 }
  0x87   :  { %v80_v33 = vpop.permute.xlu1 %79 }
  0x88   :  { %v82_v34 = vsel %vm69_vm11, %v75_v32, %v80_v33 }
  0x89   :  { %v83_v35 = vmul.f32 %v82_v34, %v64_v31 }
  0x8b   :  { %84 = vst [vmem:[%s112_s1] sm:$0xff] %v83_v35 }

</bundles_post_ra>
